<compile_context>
chip_gen: v7x
topology: tpu7x:2x2x1
jax: 0.10.0
libtpu: 0.0.40
codegen_flags: <defaults>
</compile_context>

<pallas_src>
import jax
import jax.numpy as jnp
from jax.experimental import pallas as pl
from jax.experimental.pallas import tpu as pltpu

BN_EPS = 1e-5

# Per-step VMEM budget that is safe on every generation (v7x physical VMEM is
# 64 MiB; v5e/v6e have 128 MiB but small default scoped limits).
_VMEM_BUDGET_BYTES = 48 << 20
_TARGET_BLOCK_BYTES = 4 << 20


def srm_kernel(p_ref, x_ref, o_ref):
    # p_ref: (TC, 3)  folded per-channel constants [a, b, c]
    # x_ref: (1, TC, HW) block of the input for (batch n, channel-tile cb)
    # o_ref: (1, TC, HW)
    x = x_ref[0]                                   # (TC, HW), input dtype
    hw = x.shape[1]
    inv_hw = 1.0 / hw

    # --- style pooling: f32 accumulation, two-pass (centered) variance ---
    xf = x.astype(jnp.float32)
    mean = jnp.sum(xf, axis=1, keepdims=True) * inv_hw          # (TC, 1)
    d = xf - mean
    var = jnp.sum(d * d, axis=1, keepdims=True) * (1.0 / (hw - 1))
    std = jnp.sqrt(var)                                         # (TC, 1)

    # --- folded style-integration + BatchNorm(eval) + sigmoid gate ---
    p = p_ref[...].astype(jnp.float32)             # (TC, 3)
    a, b, c = p[:, 0:1], p[:, 1:2], p[:, 2:3]
    g = jax.nn.sigmoid(mean * a + std * b + c)     # (TC, 1)

    # --- recalibrate in the *input* dtype: no full-tile f32 temp is kept
    # live across the store; the gate rounding to bf16 is free (VPU slack).
    o_ref[0] = (x * g.astype(x.dtype)).astype(o_ref.dtype)


def _round8(v):
    return max(8, (v // 8) * 8)


def _per_step_vmem_bytes(tc, hw, itemsize):
    io_block = tc * hw * itemsize            # one input (or output) block
    f32_tmp = tc * hw * 4                    # f32 cast / centered-diff temps
    # 2x double-buffered input + 2x double-buffered output + stat temporaries
    return 4 * io_block + 2 * f32_tmp


def _pick_channel_tile(C, HW, itemsize, *, n_batch,
                       budget_bytes=_VMEM_BUDGET_BYTES,
                       target_block_bytes=_TARGET_BLOCK_BYTES,
                       min_parallel_steps=4):
    """Channel tile TC: multiple of 8 (or == C), sized so one input block is
    ~target_block_bytes, the per-step VMEM footprint fits budget_bytes, and
    the parallel grid has enough steps to feed both v7x TensorCores."""
    if C <= 8:
        return C

    tc = _round8(min(C, target_block_bytes // max(1, HW * itemsize)))
    # shrink until the double-buffered footprint fits the cross-gen budget
    while tc > 8 and _per_step_vmem_bytes(tc, HW, itemsize) > budget_bytes:
        tc = _round8(tc // 2)
    # shrink until there are enough parallel grid steps (v7x has 2 TCs)
    while tc > 8 and n_batch * pl.cdiv(C, tc) < min_parallel_steps:
        tc = _round8(tc // 2)
    if tc >= C:
        return C
    # TODO(synk): if even TC=8 exceeds the VMEM budget (very large H*W), add
    # an HW-tiled reduction path ('arbitrary' grid axis + scratch accumulators
    # and a second scaling pass) instead of one giant block.
    return tc


def _vmem_limit_bytes(tc, hw, itemsize, *, budget_bytes=_VMEM_BUDGET_BYTES):
    per_step = _per_step_vmem_bytes(tc, hw, itemsize)
    # headroom for the params block + compiler scratch; never below 32 MiB so
    # the larger tiles are not silently rejected by the default scoped limit.
    return int(min(budget_bytes, max(32 << 20, per_step + (4 << 20))))


def srm_layer(x, cfc, bn_params, *, channel_tile=None):
    """x: (N, C, H, W); cfc: (C, 2); bn_params: (C, 4) = [gamma, beta, rm, rv]."""
    N, C, H, W = x.shape
    HW = H * W
    assert HW > 1, "unbiased std undefined for H*W == 1"
    x_flat = x.reshape(N, C, HW)
    itemsize = jnp.dtype(x.dtype).itemsize

    # Fold cfc and the BN affine into three per-channel constants (O(C) work,
    # done once outside the kernel):
    #   r = gamma * rsqrt(rv + eps)
    #   a = cfc0 * r ; b = cfc1 * r ; c = beta - rm * r
    gamma, beta, rm, rv = (bn_params[:, i] for i in range(4))
    r = gamma * jax.lax.rsqrt(rv + BN_EPS)
    params = jnp.stack(
        [cfc[:, 0] * r, cfc[:, 1] * r, beta - rm * r], axis=1
    ).astype(jnp.float32)                                       # (C, 3)

    if channel_tile is None:
        TC = _pick_channel_tile(C, HW, itemsize, n_batch=N)
    else:
        TC = channel_tile
    assert TC == C or TC % 8 == 0, "channel tile must be C or a multiple of 8"

    grid = (N, pl.cdiv(C, TC))          # edge blocks (C % TC != 0) are padded;
    #                                     stats on padded rows are discarded.
    vmem_limit = _vmem_limit_bytes(TC, HW, itemsize)

    # NOTE: HW that is not a multiple of 128 still works (block equals the
    # full array dim) but forces masked partial stores; see layout TODO above.
    out_flat = pl.pallas_call(
        srm_kernel,
        out_shape=jax.ShapeDtypeStruct((N, C, HW), x.dtype),
        grid_spec=pltpu.PrefetchScalarGridSpec(
            num_scalar_prefetch=0,
            grid=grid,
            in_specs=[
                pl.BlockSpec((TC, 3), lambda n, cb: (cb, 0)),
                pl.BlockSpec((1, TC, HW), lambda n, cb: (n, cb, 0)),
            ],
            out_specs=pl.BlockSpec((1, TC, HW), lambda n, cb: (n, cb, 0)),
        ),
        compiler_params=pltpu.CompilerParams(
            dimension_semantics=("parallel", "parallel"),
            vmem_limit_bytes=vmem_limit),
    )(params, x_flat)

    return out_flat.reshape(N, C, H, W)


def srm_reference(x, cfc, bn_params):
    """Pure-JAX reference for correctness check."""
    N, C, H, W = x.shape
    xf = x.reshape(N, C, -1).astype(jnp.float32)
    mean = xf.mean(axis=2)
    std = jnp.sqrt(((xf - mean[..., None]) ** 2).sum(axis=2) / (H * W - 1))
    z = mean * cfc[None, :, 0] + std * cfc[None, :, 1]
    gamma, beta, rm, rv = (bn_params[:, i] for i in range(4))
    z_hat = (z - rm[None]) / jnp.sqrt(rv[None] + BN_EPS) * gamma[None] + beta[None]
    g = jax.nn.sigmoid(z_hat)[:, :, None, None]
    return (x.astype(jnp.float32) * g).astype(x.dtype)


if __name__ == "__main__":
    N, C, H, W = 2, 4, 16, 16
    key = jax.random.PRNGKey(0)
    kx, kc, kg, kb = jax.random.split(key, 4)

    x = jax.random.normal(kx, (N, C, H, W), dtype=jnp.float32)

    # Parameters (deterministic, in-script).  The module __init__ fills cfc
    # with 0 and uses default BN params; use small random values for cfc and
    # BN weight/bias so the gating math is actually exercised.
    cfc = 0.1 * jax.random.normal(kc, (C, 2), dtype=jnp.float32)
    gamma = 1.0 + 0.1 * jax.random.normal(kg, (C,), dtype=jnp.float32)
    beta = 0.1 * jax.random.normal(kb, (C,), dtype=jnp.float32)
    running_mean = jnp.zeros((C,), dtype=jnp.float32)
    running_var = jnp.ones((C,), dtype=jnp.float32)
    bn_params = jnp.stack([gamma, beta, running_mean, running_var], axis=1)  # (C, 4)

    out = srm_layer(x, cfc, bn_params)
    out = jax.block_until_ready(out)

    ref = srm_reference(x, cfc, bn_params)
    assert out.shape == (N, C, H, W)
    assert jnp.allclose(out, ref, atol=2e-5, rtol=1e-5), "mismatch vs reference"

    print("KERNEL_OK")
</pallas_src>

<mosaic_0001>
module attributes {stable_mosaic.version = 11 : i64} {
  func.func @srm_kernel(%arg0: i32, %arg1: i32, %arg2: memref<4x3xf32, #tpu.memory_space<vmem>>, %arg3: memref<1x4x256xf32, #tpu.memory_space<vmem>>, %arg4: memref<1x4x256xf32, #tpu.memory_space<vmem>>) attributes {dimension_semantics = [#tpu.dimension_semantics<parallel>, #tpu.dimension_semantics<parallel>], iteration_bounds = array<i64: 2, 1>, scalar_prefetch = 0 : i64, scratch_operands = 0 : i64, tpu.core_type = #tpu.core_type<tc>, window_params = [{transform_indices = @transform_0, window_bounds = array<i64: 4, 3>}, {transform_indices = @transform_1, window_bounds = array<i64: 1, 4, 256>}, {transform_indices = @transform_2, window_bounds = array<i64: 1, 4, 256>}]} {
    %c0 = arith.constant 0 : index
    %c0_0 = arith.constant 0 : index
    %c0_1 = arith.constant 0 : index
    %0 = vector.load %arg3[%c0, %c0_0, %c0_1] : memref<1x4x256xf32, #tpu.memory_space<vmem>>, vector<1x4x256xf32>
    %1 = vector.shape_cast %0 : vector<1x4x256xf32> to vector<4x256xf32>
    %cst = arith.constant dense<0.000000e+00> : vector<4xf32>
    %2 = vector.multi_reduction <add>, %1, %cst [1] : vector<4x256xf32> to vector<4xf32>
    %3 = vector.shape_cast %2 : vector<4xf32> to vector<4x1xf32>
    %cst_2 = arith.constant 3.906250e-03 : f32
    %4 = vector.broadcast %cst_2 : f32 to vector<4x1xf32>
    %5 = arith.mulf %3, %4 : vector<4x1xf32>
    %6 = vector.broadcast %5 : vector<4x1xf32> to vector<4x256xf32>
    %7 = arith.subf %1, %6 : vector<4x256xf32>
    %8 = arith.mulf %7, %7 : vector<4x256xf32>
    %cst_3 = arith.constant dense<0.000000e+00> : vector<4xf32>
    %9 = vector.multi_reduction <add>, %8, %cst_3 [1] : vector<4x256xf32> to vector<4xf32>
    %10 = vector.shape_cast %9 : vector<4xf32> to vector<4x1xf32>
    %cst_4 = arith.constant 0.00392156886 : f32
    %11 = vector.broadcast %cst_4 : f32 to vector<4x1xf32>
    %12 = arith.mulf %10, %11 : vector<4x1xf32>
    %13 = math.sqrt %12 : vector<4x1xf32>
    %c0_5 = arith.constant 0 : index
    %c0_6 = arith.constant 0 : index
    %14 = vector.load %arg2[%c0_5, %c0_6] : memref<4x3xf32, #tpu.memory_space<vmem>>, vector<4x3xf32>
    %15 = vector.extract_strided_slice %14 {offsets = [0, 0], sizes = [4, 1], strides = [1, 1]} : vector<4x3xf32> to vector<4x1xf32>
    %16 = vector.extract_strided_slice %14 {offsets = [0, 1], sizes = [4, 1], strides = [1, 1]} : vector<4x3xf32> to vector<4x1xf32>
    %17 = vector.extract_strided_slice %14 {offsets = [0, 2], sizes = [4, 1], strides = [1, 1]} : vector<4x3xf32> to vector<4x1xf32>
    %18 = arith.mulf %5, %15 : vector<4x1xf32>
    %19 = arith.mulf %13, %16 : vector<4x1xf32>
    %20 = arith.addf %18, %19 : vector<4x1xf32>
    %21 = arith.addf %20, %17 : vector<4x1xf32>
    %22 = arith.negf %21 : vector<4x1xf32>
    %23 = math.exp %22 : vector<4x1xf32>
    %cst_7 = arith.constant 1.000000e+00 : f32
    %24 = vector.broadcast %cst_7 : f32 to vector<4x1xf32>
    %25 = arith.addf %24, %23 : vector<4x1xf32>
    %26 = arith.divf %24, %25 : vector<4x1xf32>
    %27 = vector.broadcast %26 : vector<4x1xf32> to vector<4x256xf32>
    %28 = arith.mulf %1, %27 : vector<4x256xf32>
    %c0_8 = arith.constant 0 : index
    %c0_9 = arith.constant 0 : index
    %c0_10 = arith.constant 0 : index
    %29 = vector.load %arg4[%c0_8, %c0_9, %c0_10] : memref<1x4x256xf32, #tpu.memory_space<vmem>>, vector<1x4x256xf32>
    %30 = vector.shape_cast %29 : vector<1x4x256xf32> to vector<4x256xf32>
    %31 = vector.shape_cast %28 : vector<4x256xf32> to vector<1x4x256xf32>
    tpu.vector_store %arg4[%c0_8, %c0_9, %c0_10], %31 {strides = array<i32>} : memref<1x4x256xf32, #tpu.memory_space<vmem>>, vector<1x4x256xf32>,
    return
  }
  func.func @transform_0(%arg0: i32, %arg1: i32) -> (i32, i32) {
    %c0_i32 = arith.constant 0 : i32
    %c0_i32_0 = arith.constant 0 : i32
    return %arg1, %c0_i32 : i32, i32
  }
  func.func @transform_1(%arg0: i32, %arg1: i32) -> (i32, i32, i32) {
    %c0_i32 = arith.constant 0 : i32
    %c0_i32_0 = arith.constant 0 : i32
    return %arg0, %arg1, %c0_i32 : i32, i32, i32
  }
  func.func @transform_2(%arg0: i32, %arg1: i32) -> (i32, i32, i32) {
    %c0_i32 = arith.constant 0 : i32
    %c0_i32_0 = arith.constant 0 : i32
    return %arg0, %arg1, %c0_i32 : i32, i32, i32
  }
}

</mosaic_0001>

<bundles_post_ra>
// kernel: tpu_custom_call.1
= control target key start
LH: loop header
LB: loop body
LE: loop exit
PB: predicated region body
PF: predicated region fallthrough
CT: control target
= control target key end

     0   :  { %7 = vsyncpa [#allocation3], 0  ;;  %s881_s0 = inlined_call_operand.hbm [shape: f32[4,3], index: 0, kind: input, shape index: {}]   ;;  %s882_s1 = inlined_call_operand.hbm [shape: f32[2,4,256], index: 1, kind: input, shape index: {}]   ;;  %s883_s2 = inlined_call_operand.hbm [shape: f32[2,4,256], index: 2, kind: output, shape index: {}]  }
   0x1   :  { %8 = vsyncpa [#allocation6], 0 }
   0x2   :  { %10 = vsyncpa [#allocation6 + $0x1], 0 }
   0x3   :  { %11 = vsyncpa [#allocation4], 0 }
   0x4   :  { %13 = vsyncpa [#allocation4 + $0x1], 0  ;;  %s657_s9 = smov 0   ;;  %s659_s10 = smov 0  }
   0x5   :  { %s661_s11 = smov 0   ;;  %s663_s12 = smov 0  }
   0x6   :  { %s665_s13 = smov 0   ;;  %s667_s14 = smov 0  }
   0x7 LB: > { %s384_s15 = sadd.s32 4294967295, %s633_s14   ;;  %s385_s16 = sadd.s32 4294967294, %s633_s14   ;;  %s633_s14 = sphi %s667_s14, %s19_s14   ;;  %s629_s13 = sphi %s665_s13, %s908_s13   ;;  %s625_s12 = sphi %s663_s12, %s907_s12   ;;  %s621_s11 = sphi %s661_s11, %s906_s11   ;;  %s617_s10 = sphi %s659_s10, %s905_s10   ;;  %s613_s9 = sphi %s657_s9, %s904_s9  }
   0x8   : > { %p79_p0 = scmp.ne.s32.totalorder %s617_s10, %s613_s9  ;;  %p691_p1 = scmp.eq.s32.totalorder %s384_s15, 0 }
   0x9   : > { %p695_p2 = scmp.eq.s32.totalorder %s384_s15, 1  ;;  %p111_p3 = scmp.eq.s32.totalorder %s385_s16, 1 }
   0xa   : > { %s888_s17 = scalar_select %p691_p1, 1, 0 }
   0xb   : > { %s889_s18 = scalar_select %p695_p2, 1, 0 }
   0xc   : > { %p701_p4 = por %p691_p1, %p79_p0  ;;  %p386_p5 = scmp.ge.s32.totalorder %s633_s14, 1 }
   0xd   : > { %p706_p6 = por %p111_p3, %p79_p0  ;;  %p118_p7 = scmp.lt.s32.totalorder %s633_s14, 3 }
   0xe   : > { %s890_s19 = scalar_select %p701_p4, 1, 0 }
   0xf   : > { %s891_s20 = scalar_select %p706_p6, 1, 0 }
  0x10   : > { %p711_p8 = pnand %p386_p5, %p118_p7  ;;  %s635_s22 = smov [#allocation2]  }
  0x11   : > { %s133_s23 = sshll.u32 %s635_s22, 4  ;;  %s31_s25 = sadd.s32 1, %s629_s13  ;;  %s134_s23 = int_to_ptr.vmem [resolvable:$true] %s133_s23 }
  0x12   : > { %s892_s21 = scalar_select %p711_p8, 1, 0 }
  0x13   : > { %p412_p10 = pneg %p711_p8  ;;  %s66_s26 = sadd.s32 1, %s621_s11 }
  0x14   : > { %p726_p12 = scmp.ge.s32.totalorder %s31_s25, 2  ;;  %s489_s30 = scalar_lea.hbm %s881_s0, 64 }
  0x15   : > { %p720_p11 = pnand %p412_p10, %p691_p1  ;;  %p490_p13 = scmp.ne.s32.totalorder %s881_s0, %s489_s30 }
  0x16   : > { %s894_s27 = scalar_select %p726_p12, 1, 0 }
  0x17   : > { %p491_p0 = pneg %p720_p11  ;;  %p496_p7 = scmp.lt.u32.totalorder %s489_s30, %s881_s0 }
  0x19   : > { %p492_p3 = pnand %p491_p0, %p490_p13 }
  0x1b   : > { %p493_p5 = pneg %p492_p3 }
  0x1d   : > { %p498_p10 = pnand %p496_p7, %p493_p5 }
  0x1f   : > { %501 = shalt.err (!%p498_p10)
}
  0x20   : > { %s502_s7 = scalar_lea.vmem %s134_s23, 64  ;;  %p510_p1 = scmp.lt.s32.totalorder %s134_s23, %s134_s23 }
  0x21   : > { %p503_p9 = scmp.ne.s32.totalorder %s134_s23, %s502_s7  ;;  %p511_p8 = scmp.lt.s32.totalorder %s502_s7, %s502_s7 }
  0x23   : > { %p505_p6 = pnand %p503_p9, %p491_p0  ;;  %p512_p2 = por %p511_p8, %p510_p1 }
  0x25   : > { %p506_p4 = pneg %p505_p6 }
  0x27   : > { %p513_p12 = pnand %p512_p2, %p506_p4 }
  0x29   : > { %516 = shalt.err (!%p513_p12)
}
  0x2a   : > { %415 = dma.hbm_to_vmem [thread:$0]  (!%p720_p11), %s881_s0, 64, %s134_s23, [#allocation3]  }
  0x2b   : > { %p895_p1 = scmp.ne.s32.totalorder %s894_s27, 0  ;;  %p73_p2 = scmp.ne.s32.totalorder %s621_s11, %s617_s10 }
  0x2c   : > { %p74_p4 = scmp.eq.s32.totalorder %s633_s14, 0  ;;  %p425_p6 = scmp.lt.s32.totalorder %s633_s14, 2 }
  0x2d   : > { %s910_s25 = smov (%p895_p1, %s31_s25), 0  ;;  %p896_p12 = scmp.ne.s32.totalorder %s889_s18, 0 }
  0x2e   : > { %s61_s16 = ssub.s32 %s629_s13, %s910_s25  ;;  %p75_p9 = por %p74_p4, %p73_p2 }
  0x2f   : > { %p64_p8 = scmp.eq.s32.totalorder %s61_s16, 0  ;;  %p758_p13 = por %p896_p12, %p73_p2 }
  0x30   : > { %s144_s24 = sand.u32 1, %s621_s11   ;;  %s402_s27 = sshll.u32 %s629_s13, 7 }
  0x31   : > { %s766_s28 = scalar_select %p64_p8, %s621_s11, %s66_s26  }
  0x32   : > { %s389_s23 = sshll.u32 %s144_s24, 3  ;;  %s772_s3 = scalar_lea.hbm %s882_s1, %s402_s27 }
  0x33   : > { %s148_s18 = scalar_lea.vmem [#allocation5], %s389_s23  ;;  %p776_p11 = pnand %p425_p6, %p75_p9 }
  0x34   : > { %s158_s4 = sshll.u32 %s148_s18, 4  ;;  %s145_s26 = scalar_lea.sflag [#allocation6], %s144_s24  ;;  %s774_s4 = int_to_ptr.vmem [resolvable:$true] %s158_s4 }
  0x35   : > { %s517_s6 = scalar_lea.hbm %s772_s3, 128  ;;  %p519_p3 = pneg %p776_p11 }
  0x36   : > { %p518_p0 = scmp.ne.s32.totalorder %s772_s3, %s517_s6  ;;  %s522_s15 = scalar_lea.hbm %s882_s1, 256 }
  0x37   : > { %p523_p10 = scmp.lt.u32.totalorder %s772_s3, %s882_s1  ;;  %p524_p1 = scmp.lt.u32.totalorder %s522_s15, %s517_s6 }
  0x38   : > { %p520_p5 = pnand %p519_p3, %p518_p0  ;;  %p526_p4 = scmp.lt.u32.totalorder %s517_s6, %s772_s3 }
  0x39   : > { %p525_p2 = por %p524_p1, %p523_p10 }
  0x3a   : > { %p521_p7 = pneg %p520_p5 }
  0x3b   : > { %p527_p6 = por %p526_p4, %p525_p2 }
  0x3d   : > { %p528_p8 = pnand %p527_p6, %p521_p7 }
  0x3f   : > { %531 = shalt.err (!%p528_p8)
}
  0x40   : > { %s532_s24 = scalar_lea.vmem %s774_s4, 128  ;;  %s636_s27 = smov [#allocation5]  }
  0x41   : > { %p533_p9 = scmp.ne.s32.totalorder %s774_s4, %s532_s24  ;;  %s537_s29 = sshll.u32 %s636_s27, 4  ;;  %s538_s29 = int_to_ptr.vmem [resolvable:$false] %s537_s29 }
  0x42   : > { %s539_s30 = scalar_lea.vmem %s538_s29, 256  ;;  %p540_p5 = scmp.lt.s32.totalorder %s774_s4, %s538_s29 }
  0x43   : > { %p535_p12 = pnand %p533_p9, %p519_p3  ;;  %p541_p10 = scmp.lt.s32.totalorder %s539_s30, %s532_s24 }
  0x45   : > { %p536_p0 = pneg %p535_p12  ;;  %p542_p1 = por %p541_p10, %p540_p5 }
  0x47   : > { %p543_p2 = pnand %p542_p1, %p536_p0 }
  0x49   : > { %546 = shalt.err (!%p543_p2)
}
  0x4a   : > { %419 = dma.hbm_to_vmem [thread:$0]  (!%p776_p11), %s772_s3, 128, %s774_s4, %s145_s26  }
  0x4b   : > { %p899_p7 = scmp.ne.s32.totalorder %s892_s21, 0 }
  0x4c   : > { %p900_p3 = scmp.ne.s32.totalorder (!%p899_p7), %s888_s17, 0 }
  0x4d   : > { %167 = sbr.rel (%p899_p7) target bundleno = 704 (0x2c0), region = 28 }
  0x54   : > { %600 = dma.done.wait (%p900_p3), [#allocation3], 64  }
  0x55   : > { %602 = vsyncadd (%p900_p3), [#allocation3], 4294967232  ;;  %s812_s18 = sand.u32 1, %s617_s10   ;;  %p901_p11 = scmp.ne.s32.totalorder %s890_s19, 0 }
  0x56   : > { %s394_s5 = sshll.u32 %s812_s18, 3  ;;  %s174_s6 = scalar_lea.sflag [#allocation6], %s812_s18 }
  0x57   : > { %s177_s3 = scalar_lea.vmem [#allocation5], %s394_s5 }
  0x58   : > { %604 = dma.done.wait (%p901_p11), %s174_s6, 128  }
  0x59   : > { %606 = vsyncadd (%p901_p11), %s174_s6, 4294967168  ;;  %vm202_vm0 = vcmask 1043456   ;;  %v198_v0 = vld [vmem:[%s177_s3] sm:$0xff]  ;;  %v637_v5 = vmov 839922192   ;;  %v213_v7 = vlaneseq  ;;  %s638_s17 = smov 127  }
  0x5a   : > { %v200_v1 = vcombine.high %v198_v0, %v198_v0  ;;  %v203_v2 = vsel %vm202_vm0, %v198_v0, 0.0  ;;  %v211_v6 = vunpack.c.l.s4 %v637_v5  ;;  %v236_v27 = vld [vmem:[#allocation2] sm:$0xf]  ;;  %s639_s19 = smov 126   ;;  %v640_v29 = vmov 0   ;;  %s403_s21 = sshll.u32 %s625_s12, 7 }
  0x5b   : > { %v214_v9 = vshrl.u32 %v213_v7, 7  ;;  %481 = vset.pattern.permute.xlu0 %v640_v29  ;;  %s197_s4 = scalar_lea.vmem [#allocation7], %s394_s5  ;;  %s832_s15 = scalar_lea.hbm %s883_s2, %s403_s21 }
  0x5c   : > { %v204_v3 = vsel %vm202_vm0, %v200_v1, 0.0  ;;  %v212_v8 = vunpack.c.0.s8 %v211_v6  ;;  %s286_s26 = sshll.u32 %s197_s4, 4  ;;  %s270_s16 = scalar_lea.sflag [#allocation4], %s812_s18  ;;  %s834_s26 = int_to_ptr.vmem [resolvable:$true] %s286_s26 }
  0x5d   : > { %v205_v4 = vadd.f32 %v204_v3, %v203_v2  ;;  %s547_s23 = scalar_lea.vmem %s834_s26, 128  ;;  %s641_s12 = smov [#allocation7]  }
  0x5e   : > { %v215_v10 = vsub.s32 %v212_v8, %v214_v9  ;;  %p548_p4 = scmp.ne.s32.totalorder %s834_s26, %s547_s23  ;;  %s551_s24 = sshll.u32 %s641_s12, 4  ;;  %s552_s24 = int_to_ptr.vmem [resolvable:$false] %s551_s24 }
  0x5f   : > { %206 = vadd.xlane.f32.xlu0 %v205_v4  ;;  %s553_s27 = scalar_lea.vmem %s552_s24, 256  ;;  %p554_p9 = scmp.lt.s32.totalorder %s834_s26, %s552_s24 }
  0x60   : > { %p549_p6 = pnand %p548_p4, %p758_p13  ;;  %p555_p12 = scmp.lt.s32.totalorder %s553_s27, %s547_s23 }
  0x62   : > { %p550_p8 = pneg %p549_p6  ;;  %p556_p0 = por %p555_p12, %p554_p9 }
  0x64   : > { %p557_p5 = pnand %p556_p0, %p550_p8 }
  0xec   : > { %v207_v11 = vpop.xlane.xlu0 %206 }
  0xed   : > { %v208_v12 = vmul.f32 0.00390625, %v207_v11 }
  0xef   : > { %v216_v13 = vrot.slane %v208_v12, %v215_v10  ;;  %v237_v31 = vmul.f32 %v236_v27, %v208_v12 }
  0xf1   : > { %v218_v14 = vsub.f32 %v198_v0, %v216_v13 }
  0xf3   : > { %v219_v15 = vmul.f32 %v218_v14, %v218_v14 }
  0xf5   : > { %v221_v16 = vcombine.high %v219_v15, %v219_v15  ;;  %v223_v17 = vsel %vm202_vm0, %v219_v15, 0.0 }
  0xf7   : > { %v224_v18 = vsel %vm202_vm0, %v221_v16, 0.0 }
  0xf8   : > { %v225_v19 = vadd.f32 %v224_v18, %v223_v17 }
  0xfa   : > { %226 = vadd.xlane.f32.xlu0 %v225_v19 }
 0x187   : > { %v227_v20 = vpop.xlane.xlu0 %226 }
 0x188   : > { %v228_v21 = vmul.f32 0.003921569, %v227_v20 }
 0x18a   : > { %483 = vrsqrt.f32 %v228_v21  ;;  %vm231_vm1 = vcmp.eq.f32.partialorder %v228_v21, inf  ;;  %v234_v24 = vand.u32 2147483648, %v228_v21  ;;  %vm233_vm2 = vcmp.eq.f32.partialorder %v228_v21, 0.0 }
 0x194   : > { %v484_v22 = vpop.eup %483 }
 0x195   : > { %v230_v23 = vmul.f32 %v484_v22, %v228_v21 }
 0x197   : > { %v232_v25 = vsel %vm231_vm1, %v228_v21, %v230_v23 }
 0x198   : > { %v235_v26 = vsel %vm233_vm2, %v234_v24, %v232_v25 }
 0x199   : > { %v238_v28 = vmul.f32 %v236_v27, %v235_v26 }
 0x19b   : > { %240 = vrot.lane.b32.xlu1 %v238_v28, %s638_s17 }
 0x19f   : > { %245 = vrot.lane.b32.xlu1 %v236_v27, %s639_s19 }
 0x20d   : > { %v241_v30 = vpop.permute.xlu1 %240 }
 0x20e   : > { %v243_v32 = vadd.f32 %v241_v30, %v237_v31 }
 0x211   : > { %v246_v33 = vpop.permute.xlu1 %245 }
 0x212   : > { %v248_v34 = vadd.f32 %v246_v33, %v243_v32 }
 0x214   : > { %v396_v35 = vmul.f32 -1.442695, %v248_v34 }
 0x216   : > { %485 = vpow2.f32 %v396_v35 }
 0x220   : > { %v486_v36 = vpop.eup %485 }
 0x221   : > { %v252_v37 = vadd.f32 1.0, %v486_v36 }
 0x223   : > { %487 = vrcp.f32 %v252_v37 }
 0x22d   : > { %v488_v38 = vpop.eup %487 }
 0x22e   : > { %257 = vperm.xlu0 %481, %v488_v38  }
 0x2ad   : > { %v258_v39 = vpop.permute.xlu0 %257 }
 0x2ae   : > { %v265_v40 = vrot.slane %v258_v39, %v215_v10 }
 0x2b0   : > { %v267_v41 = vmul.f32 %v265_v40, %v198_v0 }
 0x2b2   : > { %268 = vst [vmem:[%s197_s4] sm:$0xff] %v267_v41 }
 0x2b3   : > { %560 = shalt.err (!%p557_p5)
}
 0x2b4   : > { %s561_s29 = scalar_lea.hbm %s832_s15, 128  ;;  %s565_s5 = scalar_lea.hbm %s883_s2, 256 }
 0x2b5   : > { %p562_p10 = scmp.ne.s32.totalorder %s832_s15, %s561_s29  ;;  %p566_p7 = scmp.lt.u32.totalorder %s832_s15, %s883_s2 }
 0x2b6   : > { %p567_p3 = scmp.lt.u32.totalorder %s565_s5, %s561_s29  ;;  %p569_p4 = scmp.lt.u32.totalorder %s561_s29, %s832_s15 }
 0x2b7   : > { %p563_p1 = pnand %p562_p10, %p758_p13 }
 0x2b8   : > { %p568_p11 = por %p567_p3, %p566_p7 }
 0x2b9   : > { %p564_p2 = pneg %p563_p1 }
 0x2ba   : > { %p570_p6 = por %p569_p4, %p568_p11 }
 0x2bc   : > { %p571_p8 = pnand %p570_p6, %p564_p2 }
 0x2be   : > { %574 = shalt.err (!%p571_p8)
}
 0x2bf   : > { %410 = dma.vmem_to_hbm [thread:$0]  (%p758_p13), %s834_s26, 128, %s832_s15, %s270_s16  }
 0x2c0 PF: > { %s298_s17 = sand.u32 1, %s613_s9   ;;  %p902_p9 = scmp.ne.s32.totalorder %s891_s20, 0 }
 0x2c1   : > { %p903_p12 = scmp.ge.s32.totalorder %s633_s14, 2  ;;  %s299_s19 = scalar_lea.sflag [#allocation4], %s298_s17 }
 0x2c3   : > { %p421_p0 = pnand %p903_p12, %p902_p9 }
 0x2c5   : > { %608 = dma.done.wait (!%p421_p0), %s299_s19, 128  }
 0x2c6   : > { %610 = vsyncadd (!%p421_p0), %s299_s19, 4294967168  ;;  %s19_s14 = sadd.s32 1, %s633_s14   ;;  %s904_s9 = smov %s617_s10 }
 0x2c7   : > { %p16_p5 = scmp.ge.s32.totalorder %s19_s14, 4   ;;  %s905_s10 = smov %s621_s11 }
 0x2c8   : > { %s906_s11 = smov %s766_s28  ;;  %s907_s12 = smov %s629_s13 }
 0x2c9   : > { %s908_s13 = smov %s910_s25  ;;  %18 = sbr.rel (!%p16_p5) target bundleno = 7 (0x7), region = 79 }
 0x2d0   :  { %304 = vsyncpa [#allocation3], 1 }
 0x2d1   :  { %306 = vsyncpa [#allocation3 + $0x1], 1 }
 0x2d2   :  { %307 = vsyncpa [#allocation6], 1 }
 0x2d3   :  { %309 = vsyncpa [#allocation6 + $0x1], 1 }
 0x2d4   :  { %310 = vsyncpa [#allocation4], 1 }
 0x2d5   :  { %312 = vsyncpa [#allocation4 + $0x1], 1 }

</bundles_post_ra>
